<compile_context>
chip_gen: v6e
topology: v6e:2x2x1
jax: 0.10.0
libtpu: 0.0.40
codegen_flags: <defaults>
</compile_context>

<pallas_src>
import functools

import jax
import jax.numpy as jnp
from jax import lax
from jax.experimental import pallas as pl
from jax.experimental.pallas import tpu as pltpu

_BN_EPS = 1e-5
_LANE = 128


def _pad_to_lane(n: int) -> int:
    return ((n + _LANE - 1) // _LANE) * _LANE


# ---------------------------------------------------------------------------
# Fused Pallas kernel: whole generator forward in one body, all operands in VMEM.
# ---------------------------------------------------------------------------
def _generator_fused_kernel(noise_ref, w1_ref, w2_ref, w3_ref, w4_ref,
                            wo_ref, gb_ref, bo_ref, o_ref, *, widths):
    inv_n = 1.0 / noise_ref.shape[0]

    def block(x_f32, w_ref, layer, width):
        # Linear on the bf16 MXU path with f32 accumulation. Pre-BN bias omitted: a per-feature
        # constant cancels exactly in training-mode BN centering.
        y = jnp.dot(x_f32.astype(jnp.bfloat16), w_ref[...],
                    preferred_element_type=jnp.float32)
        # BatchNorm1d (training mode): biased batch stats via E[y^2]-E[y]^2, folded into one
        # per-feature scale/shift so only 4 full-width VPU ops touch the (B, width) tile.
        mean = jnp.sum(y, axis=0, keepdims=True) * inv_n
        msq = jnp.sum(y * y, axis=0, keepdims=True) * inv_n
        var = jnp.maximum(msq - mean * mean, 0.0)
        inv_std = lax.rsqrt(var + _BN_EPS)
        gamma = gb_ref[layer:layer + 1, 0:width]        # static slices of the packed
        beta = gb_ref[layer + 4:layer + 5, 0:width]     # gamma/beta operand, (1, width)
        scale = gamma * inv_std                         # (1, width)
        shift = beta - mean * scale                     # (1, width)
        return jnp.maximum(y * scale + shift, 0.0)      # ReLU

    x = noise_ref[...]                                  # (B, z_pad) f32, stays in vregs
    x = block(x, w1_ref, 0, widths[0])                  # (B, h_pad)
    x = block(x, w2_ref, 1, widths[1])                  # (B, 2h_pad)
    x = block(x, w3_ref, 2, widths[2])                  # (B, 4h_pad)
    x = block(x, w4_ref, 3, widths[3])                  # (B, 8h_pad)

    # Final Linear (with bias) + Sigmoid = rcp(1 + exp(-y)): exp on EUP, divide via approx rcp
    # (also EUP); clamp keeps the exact [0, 1] sigmoid range under the approximation.
    y = jnp.dot(x.astype(jnp.bfloat16), wo_ref[...],
                preferred_element_type=jnp.float32) + bo_ref[...]
    s = pl.reciprocal(1.0 + jnp.exp(-y), approx=True)
    o_ref[...] = jnp.minimum(s, 1.0).astype(o_ref.dtype)


def _vmem_spec():
    return pl.BlockSpec(memory_space=pltpu.MemorySpace.VMEM)


# ---------------------------------------------------------------------------
# Wrapper: single full-array VMEM block per operand (no grid: BN couples the batch axis).
# ---------------------------------------------------------------------------
@functools.partial(jax.jit, static_argnames=("z_pad", "widths", "im_dim", "im_pad"))
def _forward_impl(noise, w1, w2, w3, w4, wo, gb, bo, *,
                  z_pad, widths, im_dim, im_pad):
    batch = noise.shape[0]
    noise_p = jnp.pad(noise, ((0, 0), (0, z_pad - noise.shape[1])))

    def nbytes(a):
        return a.size * a.dtype.itemsize

    param_bytes = sum(nbytes(a) for a in (w1, w2, w3, w4, wo, gb, bo))
    io_bytes = batch * (z_pad + im_pad) * 4
    act_bytes = batch * max(widths) * 4
    vmem_limit = int(min(max(2 * io_bytes + param_bytes + 8 * act_bytes + (8 << 20),
                             32 << 20), 64 << 20))

    layer_dims = [(z_pad, widths[0]), (widths[0], widths[1]), (widths[1], widths[2]),
                  (widths[2], widths[3]), (widths[3], im_pad)]
    flops = sum(2 * batch * a * b for a, b in layer_dims)
    transcendentals = batch * im_pad + sum(widths)
    cost = pl.CostEstimate(flops=flops, transcendentals=transcendentals,
                           bytes_accessed=param_bytes + io_bytes)

    out_p = pl.pallas_call(
        functools.partial(_generator_fused_kernel, widths=widths),
        out_shape=jax.ShapeDtypeStruct((batch, im_pad), jnp.float32),
        in_specs=[_vmem_spec()] * 8,
        out_specs=_vmem_spec(),
        compiler_params=pltpu.CompilerParams(vmem_limit_bytes=vmem_limit),
        cost_estimate=cost,
    )(noise_p, w1, w2, w3, w4, wo, gb, bo)
    return out_p[:, :im_dim]


def gans_generator_forward(noise, params, meta):
    w1, w2, w3, w4 = params["w"]
    return _forward_impl(noise, w1, w2, w3, w4, params["wo"], params["gb"], params["bo"],
                         z_pad=meta["z_pad"], widths=meta["widths"],
                         im_dim=meta["im_dim"], im_pad=meta["im_pad"])


# ---------------------------------------------------------------------------
# Parameter init (mirrors nn.Linear / nn.BatchNorm1d defaults).
# Linear weights stored pre-transposed as [in, out], zero-padded to lane-dense widths, bf16.
# Pre-BN biases are not materialized (they cancel in training-mode BN centering).
# ---------------------------------------------------------------------------
def init_generator_params(key, z_dim, im_dim, hidden_dim):
    dims = [z_dim, hidden_dim, hidden_dim * 2, hidden_dim * 4, hidden_dim * 8]
    pdims = [_pad_to_lane(d) for d in dims]
    im_pad = _pad_to_lane(im_dim)
    wmax = max(pdims[1:])
    keys = jax.random.split(key, 6)

    ws = []
    for i in range(4):
        bound = 1.0 / float(dims[i]) ** 0.5
        w = jax.random.uniform(keys[i], (dims[i], dims[i + 1]), jnp.float32, -bound, bound)
        wp = jnp.zeros((pdims[i], pdims[i + 1]), jnp.float32)
        wp = wp.at[:dims[i], :dims[i + 1]].set(w)
        ws.append(wp.astype(jnp.bfloat16))

    bound = 1.0 / float(dims[4]) ** 0.5
    wo = jax.random.uniform(keys[4], (dims[4], im_dim), jnp.float32, -bound, bound)
    wo_p = jnp.zeros((pdims[4], im_pad), jnp.float32).at[:dims[4], :im_dim].set(wo)
    wo_p = wo_p.astype(jnp.bfloat16)
    bo = jax.random.uniform(keys[5], (im_dim,), jnp.float32, -bound, bound)
    bo_p = jnp.zeros((1, im_pad), jnp.float32).at[0, :im_dim].set(bo)

    # Packed gamma/beta: rows 0..3 = gamma (1 on real features, 0 on padding),
    # rows 4..7 = beta (0 everywhere: PyTorch BatchNorm1d default).
    gb = jnp.zeros((8, wmax), jnp.float32)
    for i in range(4):
        gb = gb.at[i, :dims[i + 1]].set(1.0)

    params = {"w": tuple(ws), "wo": wo_p, "gb": gb, "bo": bo_p}
    meta = {"z_pad": pdims[0], "widths": tuple(pdims[1:5]),
            "im_dim": im_dim, "im_pad": im_pad}
    return params, meta


# ---------------------------------------------------------------------------
# Pure-JAX reference (same bf16-rounded parameters) for a tolerance check.
# ---------------------------------------------------------------------------
def _reference_forward(noise, params, meta):
    x = jnp.pad(noise, ((0, 0), (0, meta["z_pad"] - noise.shape[1])))
    gb = params["gb"]
    for i, w in enumerate(params["w"]):
        width = meta["widths"][i]
        xb = x.astype(jnp.bfloat16).astype(jnp.float32)
        y = xb @ w.astype(jnp.float32)
        mean = jnp.mean(y, axis=0, keepdims=True)
        var = jnp.mean((y - mean) ** 2, axis=0, keepdims=True)
        gamma = gb[i:i + 1, :width]
        beta = gb[i + 4:i + 5, :width]
        x = jnp.maximum((y - mean) * lax.rsqrt(var + _BN_EPS) * gamma + beta, 0.0)
    xb = x.astype(jnp.bfloat16).astype(jnp.float32)
    y = xb @ params["wo"].astype(jnp.float32) + params["bo"]
    return jax.nn.sigmoid(y)[:, :meta["im_dim"]]


# ---------------------------------------------------------------------------
# main
# ---------------------------------------------------------------------------
if __name__ == "__main__":
    z_dim, im_dim, hidden_dim = 16, 64, 32
    batch = 8  # small smoke-test batch; the kernel keeps the whole batch in one VMEM block

    key = jax.random.PRNGKey(0)
    k_noise, k_params = jax.random.split(key)

    noise = jax.random.normal(k_noise, (batch, z_dim), jnp.float32)
    params, meta = init_generator_params(k_params, z_dim, im_dim, hidden_dim)

    out = gans_generator_forward(noise, params, meta)
    out = jax.block_until_ready(out)

    assert out.shape == (batch, im_dim)
    assert bool(jnp.all(jnp.isfinite(out)))
    assert bool(jnp.all((out >= 0.0) & (out <= 1.0)))  # sigmoid range

    # Explicit tolerance against a pure-JAX reference built from the same bf16 parameters
    # (loose because of bf16 matmuls + approx-reciprocal sigmoid).
    ref = _reference_forward(noise, params, meta)
    assert bool(jnp.max(jnp.abs(out - ref)) <= 2e-2)

    print("KERNEL_OK")
</pallas_src>

<mosaic_0001>
module attributes {stable_mosaic.version = 11 : i64} {
  func.func @_generator_fused_kernel(%arg0: memref<8x128xf32, #tpu.memory_space<vmem>>, %arg1: memref<128x128xbf16, #tpu.memory_space<vmem>>, %arg2: memref<128x128xbf16, #tpu.memory_space<vmem>>, %arg3: memref<128x128xbf16, #tpu.memory_space<vmem>>, %arg4: memref<128x256xbf16, #tpu.memory_space<vmem>>, %arg5: memref<256x128xbf16, #tpu.memory_space<vmem>>, %arg6: memref<8x256xf32, #tpu.memory_space<vmem>>, %arg7: memref<1x128xf32, #tpu.memory_space<vmem>>, %arg8: memref<8x128xf32, #tpu.memory_space<vmem>>) attributes {dimension_semantics = [], scalar_prefetch = 0 : i64, scratch_operands = 0 : i64, tpu.core_type = #tpu.core_type<tc>} {
    %c0 = arith.constant 0 : index
    %c0_0 = arith.constant 0 : index
    %0 = vector.load %arg0[%c0, %c0_0] : memref<8x128xf32, #tpu.memory_space<vmem>>, vector<8x128xf32>
    %1 = arith.truncf %0 : vector<8x128xf32> to vector<8x128xbf16>
    %c0_1 = arith.constant 0 : index
    %c0_2 = arith.constant 0 : index
    %2 = vector.load %arg1[%c0_1, %c0_2] : memref<128x128xbf16, #tpu.memory_space<vmem>>, vector<128x128xbf16>
    %cst = arith.constant dense<0.000000e+00> : vector<8x128xf32>
    %3 = tpu.matmul %1, %2, %cst {dimension_numbers = #tpu.dot_dimension_numbers<[1], [0], [0], [1], [0, 0, 1, 1], [], []>} : vector<8x128xbf16>, vector<128x128xbf16>, vector<8x128xf32> -> vector<8x128xf32>
    %cst_3 = arith.constant dense<0.000000e+00> : vector<128xf32>
    %4 = vector.multi_reduction <add>, %3, %cst_3 [0] : vector<8x128xf32> to vector<128xf32>
    %5 = vector.shape_cast %4 : vector<128xf32> to vector<1x128xf32>
    %cst_4 = arith.constant 1.250000e-01 : f32
    %6 = vector.broadcast %cst_4 : f32 to vector<1x128xf32>
    %7 = arith.mulf %5, %6 : vector<1x128xf32>
    %8 = arith.mulf %3, %3 : vector<8x128xf32>
    %cst_5 = arith.constant dense<0.000000e+00> : vector<128xf32>
    %9 = vector.multi_reduction <add>, %8, %cst_5 [0] : vector<8x128xf32> to vector<128xf32>
    %10 = vector.shape_cast %9 : vector<128xf32> to vector<1x128xf32>
    %cst_6 = arith.constant 1.250000e-01 : f32
    %11 = vector.broadcast %cst_6 : f32 to vector<1x128xf32>
    %12 = arith.mulf %10, %11 : vector<1x128xf32>
    %13 = arith.mulf %7, %7 : vector<1x128xf32>
    %14 = arith.subf %12, %13 : vector<1x128xf32>
    %cst_7 = arith.constant 0.000000e+00 : f32
    %15 = vector.broadcast %cst_7 : f32 to vector<1x128xf32>
    %16 = arith.maximumf %14, %15 : vector<1x128xf32>
    %cst_8 = arith.constant 9.99999974E-6 : f32
    %17 = vector.broadcast %cst_8 : f32 to vector<1x128xf32>
    %18 = arith.addf %16, %17 : vector<1x128xf32>
    %19 = math.rsqrt %18 : vector<1x128xf32>
    %c0_9 = arith.constant 0 : index
    %c0_10 = arith.constant 0 : index
    %20 = vector.load %arg6[%c0_9, %c0_10] : memref<8x256xf32, #tpu.memory_space<vmem>>, vector<1x128xf32>
    %c4 = arith.constant 4 : index
    %c0_11 = arith.constant 0 : index
    %21 = vector.load %arg6[%c4, %c0_11] : memref<8x256xf32, #tpu.memory_space<vmem>>, vector<1x128xf32>
    %22 = arith.mulf %20, %19 : vector<1x128xf32>
    %23 = arith.mulf %7, %22 : vector<1x128xf32>
    %24 = arith.subf %21, %23 : vector<1x128xf32>
    %25 = vector.broadcast %22 : vector<1x128xf32> to vector<8x128xf32>
    %26 = arith.mulf %3, %25 : vector<8x128xf32>
    %27 = vector.broadcast %24 : vector<1x128xf32> to vector<8x128xf32>
    %28 = arith.addf %26, %27 : vector<8x128xf32>
    %cst_12 = arith.constant 0.000000e+00 : f32
    %29 = vector.broadcast %cst_12 : f32 to vector<8x128xf32>
    %30 = arith.maximumf %28, %29 : vector<8x128xf32>
    %31 = arith.truncf %30 : vector<8x128xf32> to vector<8x128xbf16>
    %c0_13 = arith.constant 0 : index
    %c0_14 = arith.constant 0 : index
    %32 = vector.load %arg2[%c0_13, %c0_14] : memref<128x128xbf16, #tpu.memory_space<vmem>>, vector<128x128xbf16>
    %cst_15 = arith.constant dense<0.000000e+00> : vector<8x128xf32>
    %33 = tpu.matmul %31, %32, %cst_15 {dimension_numbers = #tpu.dot_dimension_numbers<[1], [0], [0], [1], [0, 0, 1, 1], [], []>} : vector<8x128xbf16>, vector<128x128xbf16>, vector<8x128xf32> -> vector<8x128xf32>
    %cst_16 = arith.constant dense<0.000000e+00> : vector<128xf32>
    %34 = vector.multi_reduction <add>, %33, %cst_16 [0] : vector<8x128xf32> to vector<128xf32>
    %35 = vector.shape_cast %34 : vector<128xf32> to vector<1x128xf32>
    %cst_17 = arith.constant 1.250000e-01 : f32
    %36 = vector.broadcast %cst_17 : f32 to vector<1x128xf32>
    %37 = arith.mulf %35, %36 : vector<1x128xf32>
    %38 = arith.mulf %33, %33 : vector<8x128xf32>
    %cst_18 = arith.constant dense<0.000000e+00> : vector<128xf32>
    %39 = vector.multi_reduction <add>, %38, %cst_18 [0] : vector<8x128xf32> to vector<128xf32>
    %40 = vector.shape_cast %39 : vector<128xf32> to vector<1x128xf32>
    %cst_19 = arith.constant 1.250000e-01 : f32
    %41 = vector.broadcast %cst_19 : f32 to vector<1x128xf32>
    %42 = arith.mulf %40, %41 : vector<1x128xf32>
    %43 = arith.mulf %37, %37 : vector<1x128xf32>
    %44 = arith.subf %42, %43 : vector<1x128xf32>
    %cst_20 = arith.constant 0.000000e+00 : f32
    %45 = vector.broadcast %cst_20 : f32 to vector<1x128xf32>
    %46 = arith.maximumf %44, %45 : vector<1x128xf32>
    %cst_21 = arith.constant 9.99999974E-6 : f32
    %47 = vector.broadcast %cst_21 : f32 to vector<1x128xf32>
    %48 = arith.addf %46, %47 : vector<1x128xf32>
    %49 = math.rsqrt %48 : vector<1x128xf32>
    %c1 = arith.constant 1 : index
    %c0_22 = arith.constant 0 : index
    %50 = vector.load %arg6[%c1, %c0_22] : memref<8x256xf32, #tpu.memory_space<vmem>>, vector<1x128xf32>
    %c5 = arith.constant 5 : index
    %c0_23 = arith.constant 0 : index
    %51 = vector.load %arg6[%c5, %c0_23] : memref<8x256xf32, #tpu.memory_space<vmem>>, vector<1x128xf32>
    %52 = arith.mulf %50, %49 : vector<1x128xf32>
    %53 = arith.mulf %37, %52 : vector<1x128xf32>
    %54 = arith.subf %51, %53 : vector<1x128xf32>
    %55 = vector.broadcast %52 : vector<1x128xf32> to vector<8x128xf32>
    %56 = arith.mulf %33, %55 : vector<8x128xf32>
    %57 = vector.broadcast %54 : vector<1x128xf32> to vector<8x128xf32>
    %58 = arith.addf %56, %57 : vector<8x128xf32>
    %cst_24 = arith.constant 0.000000e+00 : f32
    %59 = vector.broadcast %cst_24 : f32 to vector<8x128xf32>
    %60 = arith.maximumf %58, %59 : vector<8x128xf32>
    %61 = arith.truncf %60 : vector<8x128xf32> to vector<8x128xbf16>
    %c0_25 = arith.constant 0 : index
    %c0_26 = arith.constant 0 : index
    %62 = vector.load %arg3[%c0_25, %c0_26] : memref<128x128xbf16, #tpu.memory_space<vmem>>, vector<128x128xbf16>
    %cst_27 = arith.constant dense<0.000000e+00> : vector<8x128xf32>
    %63 = tpu.matmul %61, %62, %cst_27 {dimension_numbers = #tpu.dot_dimension_numbers<[1], [0], [0], [1], [0, 0, 1, 1], [], []>} : vector<8x128xbf16>, vector<128x128xbf16>, vector<8x128xf32> -> vector<8x128xf32>
    %cst_28 = arith.constant dense<0.000000e+00> : vector<128xf32>
    %64 = vector.multi_reduction <add>, %63, %cst_28 [0] : vector<8x128xf32> to vector<128xf32>
    %65 = vector.shape_cast %64 : vector<128xf32> to vector<1x128xf32>
    %cst_29 = arith.constant 1.250000e-01 : f32
    %66 = vector.broadcast %cst_29 : f32 to vector<1x128xf32>
    %67 = arith.mulf %65, %66 : vector<1x128xf32>
    %68 = arith.mulf %63, %63 : vector<8x128xf32>
    %cst_30 = arith.constant dense<0.000000e+00> : vector<128xf32>
    %69 = vector.multi_reduction <add>, %68, %cst_30 [0] : vector<8x128xf32> to vector<128xf32>
    %70 = vector.shape_cast %69 : vector<128xf32> to vector<1x128xf32>
    %cst_31 = arith.constant 1.250000e-01 : f32
    %71 = vector.broadcast %cst_31 : f32 to vector<1x128xf32>
    %72 = arith.mulf %70, %71 : vector<1x128xf32>
    %73 = arith.mulf %67, %67 : vector<1x128xf32>
    %74 = arith.subf %72, %73 : vector<1x128xf32>
    %cst_32 = arith.constant 0.000000e+00 : f32
    %75 = vector.broadcast %cst_32 : f32 to vector<1x128xf32>
    %76 = arith.maximumf %74, %75 : vector<1x128xf32>
    %cst_33 = arith.constant 9.99999974E-6 : f32
    %77 = vector.broadcast %cst_33 : f32 to vector<1x128xf32>
    %78 = arith.addf %76, %77 : vector<1x128xf32>
    %79 = math.rsqrt %78 : vector<1x128xf32>
    %c2 = arith.constant 2 : index
    %c0_34 = arith.constant 0 : index
    %80 = vector.load %arg6[%c2, %c0_34] : memref<8x256xf32, #tpu.memory_space<vmem>>, vector<1x128xf32>
    %c6 = arith.constant 6 : index
    %c0_35 = arith.constant 0 : index
    %81 = vector.load %arg6[%c6, %c0_35] : memref<8x256xf32, #tpu.memory_space<vmem>>, vector<1x128xf32>
    %82 = arith.mulf %80, %79 : vector<1x128xf32>
    %83 = arith.mulf %67, %82 : vector<1x128xf32>
    %84 = arith.subf %81, %83 : vector<1x128xf32>
    %85 = vector.broadcast %82 : vector<1x128xf32> to vector<8x128xf32>
    %86 = arith.mulf %63, %85 : vector<8x128xf32>
    %87 = vector.broadcast %84 : vector<1x128xf32> to vector<8x128xf32>
    %88 = arith.addf %86, %87 : vector<8x128xf32>
    %cst_36 = arith.constant 0.000000e+00 : f32
    %89 = vector.broadcast %cst_36 : f32 to vector<8x128xf32>
    %90 = arith.maximumf %88, %89 : vector<8x128xf32>
    %91 = arith.truncf %90 : vector<8x128xf32> to vector<8x128xbf16>
    %c0_37 = arith.constant 0 : index
    %c0_38 = arith.constant 0 : index
    %92 = vector.load %arg4[%c0_37, %c0_38] : memref<128x256xbf16, #tpu.memory_space<vmem>>, vector<128x256xbf16>
    %cst_39 = arith.constant dense<0.000000e+00> : vector<8x256xf32>
    %93 = tpu.matmul %91, %92, %cst_39 {dimension_numbers = #tpu.dot_dimension_numbers<[1], [0], [0], [1], [0, 0, 1, 1], [], []>} : vector<8x128xbf16>, vector<128x256xbf16>, vector<8x256xf32> -> vector<8x256xf32>
    %cst_40 = arith.constant dense<0.000000e+00> : vector<256xf32>
    %94 = vector.multi_reduction <add>, %93, %cst_40 [0] : vector<8x256xf32> to vector<256xf32>
    %95 = vector.shape_cast %94 : vector<256xf32> to vector<1x256xf32>
    %cst_41 = arith.constant 1.250000e-01 : f32
    %96 = vector.broadcast %cst_41 : f32 to vector<1x256xf32>
    %97 = arith.mulf %95, %96 : vector<1x256xf32>
    %98 = arith.mulf %93, %93 : vector<8x256xf32>
    %cst_42 = arith.constant dense<0.000000e+00> : vector<256xf32>
    %99 = vector.multi_reduction <add>, %98, %cst_42 [0] : vector<8x256xf32> to vector<256xf32>
    %100 = vector.shape_cast %99 : vector<256xf32> to vector<1x256xf32>
    %cst_43 = arith.constant 1.250000e-01 : f32
    %101 = vector.broadcast %cst_43 : f32 to vector<1x256xf32>
    %102 = arith.mulf %100, %101 : vector<1x256xf32>
    %103 = arith.mulf %97, %97 : vector<1x256xf32>
    %104 = arith.subf %102, %103 : vector<1x256xf32>
    %cst_44 = arith.constant 0.000000e+00 : f32
    %105 = vector.broadcast %cst_44 : f32 to vector<1x256xf32>
    %106 = arith.maximumf %104, %105 : vector<1x256xf32>
    %cst_45 = arith.constant 9.99999974E-6 : f32
    %107 = vector.broadcast %cst_45 : f32 to vector<1x256xf32>
    %108 = arith.addf %106, %107 : vector<1x256xf32>
    %109 = math.rsqrt %108 : vector<1x256xf32>
    %c3 = arith.constant 3 : index
    %c0_46 = arith.constant 0 : index
    %110 = vector.load %arg6[%c3, %c0_46] : memref<8x256xf32, #tpu.memory_space<vmem>>, vector<1x256xf32>
    %c7 = arith.constant 7 : index
    %c0_47 = arith.constant 0 : index
    %111 = vector.load %arg6[%c7, %c0_47] : memref<8x256xf32, #tpu.memory_space<vmem>>, vector<1x256xf32>
    %112 = arith.mulf %110, %109 : vector<1x256xf32>
    %113 = arith.mulf %97, %112 : vector<1x256xf32>
    %114 = arith.subf %111, %113 : vector<1x256xf32>
    %115 = vector.broadcast %112 : vector<1x256xf32> to vector<8x256xf32>
    %116 = arith.mulf %93, %115 : vector<8x256xf32>
    %117 = vector.broadcast %114 : vector<1x256xf32> to vector<8x256xf32>
    %118 = arith.addf %116, %117 : vector<8x256xf32>
    %cst_48 = arith.constant 0.000000e+00 : f32
    %119 = vector.broadcast %cst_48 : f32 to vector<8x256xf32>
    %120 = arith.maximumf %118, %119 : vector<8x256xf32>
    %121 = arith.truncf %120 : vector<8x256xf32> to vector<8x256xbf16>
    %c0_49 = arith.constant 0 : index
    %c0_50 = arith.constant 0 : index
    %122 = vector.load %arg5[%c0_49, %c0_50] : memref<256x128xbf16, #tpu.memory_space<vmem>>, vector<256x128xbf16>
    %cst_51 = arith.constant dense<0.000000e+00> : vector<8x128xf32>
    %123 = tpu.matmul %121, %122, %cst_51 {dimension_numbers = #tpu.dot_dimension_numbers<[1], [0], [0], [1], [0, 0, 1, 1], [], []>} : vector<8x256xbf16>, vector<256x128xbf16>, vector<8x128xf32> -> vector<8x128xf32>
    %c0_52 = arith.constant 0 : index
    %c0_53 = arith.constant 0 : index
    %124 = vector.load %arg7[%c0_52, %c0_53] : memref<1x128xf32, #tpu.memory_space<vmem>>, vector<1x128xf32>
    %125 = vector.broadcast %124 : vector<1x128xf32> to vector<8x128xf32>
    %126 = arith.addf %123, %125 : vector<8x128xf32>
    %cst_54 = arith.constant 0.000000e+00 : f32
    %127 = vector.broadcast %cst_54 : f32 to vector<8x128xf32>
    %128 = arith.subf %127, %126 : vector<8x128xf32>
    %129 = math.exp %128 : vector<8x128xf32>
    %cst_55 = arith.constant 1.000000e+00 : f32
    %130 = vector.broadcast %cst_55 : f32 to vector<8x128xf32>
    %131 = arith.addf %130, %129 : vector<8x128xf32>
    %132 = tpu.reciprocal %131 {approx = true} : vector<8x128xf32> -> vector<8x128xf32>
    %cst_56 = arith.constant 1.000000e+00 : f32
    %133 = vector.broadcast %cst_56 : f32 to vector<8x128xf32>
    %134 = arith.minimumf %132, %133 : vector<8x128xf32>
    %c0_57 = arith.constant 0 : index
    %c0_58 = arith.constant 0 : index
    %135 = vector.load %arg8[%c0_57, %c0_58] : memref<8x128xf32, #tpu.memory_space<vmem>>, vector<8x128xf32>
    tpu.vector_store %arg8[%c0_57, %c0_58], %134 {strides = array<i32>} : memref<8x128xf32, #tpu.memory_space<vmem>>, vector<8x128xf32>,
    return
  }
}

</mosaic_0001>

<bundles_post_ra>
// kernel: _forward_impl.1
= control target key start
LH: loop header
LB: loop body
LE: loop exit
PB: predicated region body
PF: predicated region fallthrough
CT: control target
= control target key end

     0   :  { %13 = vsyncpa [#allocation3], 0  ;;  %s1501_s0 = inlined_call_operand.vmem [shape: f32[8,128], index: 0, kind: input, shape index: {}]   ;;  %s1502_s1 = inlined_call_operand.hbm [shape: bf16[128,128], index: 1, kind: input, shape index: {}]   ;;  %s1503_s2 = inlined_call_operand.hbm [shape: bf16[128,128], index: 2, kind: input, shape index: {}]   ;;  %s1504_s3 = inlined_call_operand.hbm [shape: bf16[128,128], index: 3, kind: input, shape index: {}]   ;;  %s1505_s4 = inlined_call_operand.hbm [shape: bf16[128,256], index: 4, kind: input, shape index: {}]   ;;  %s1506_s5 = inlined_call_operand.hbm [shape: bf16[256,128], index: 5, kind: input, shape index: {}]   ;;  %s1507_s6 = inlined_call_operand.vmem [shape: f32[8,256], index: 6, kind: input, shape index: {}]   ;;  %s1508_s7 = inlined_call_operand.vmem [shape: f32[1,128], index: 7, kind: input, shape index: {}]   ;;  %s1509_s8 = inlined_call_operand.hbm [shape: f32[8,128], index: 8, kind: output, shape index: {}]  }
   0x1   :  { %14 = vsyncpa [#allocation6], 0 }
   0x2   :  { %15 = vsyncpa [#allocation9], 0 }
   0x3   :  { %16 = vsyncpa [#allocation4], 0  ;;  %s1338_s27 = smov [#allocation5]   ;;  %s1339_s29 = smov [#allocation8]  }
   0x4   :  { %s36_s28 = sshll.u32 %s1338_s27, 4  ;;  %s60_s30 = sshll.u32 %s1339_s29, 4  ;;  %s37_s28 = int_to_ptr.vmem [resolvable:$true] %s36_s28  ;;  %s61_s30 = int_to_ptr.vmem [resolvable:$true] %s60_s30 }
   0x5   :  { %s1218_s9 = scalar_lea.vmem %s37_s28, 1024  ;;  %p1223_p1 = scmp.lt.s32.totalorder %s37_s28, %s37_s28 }
   0x6   :  { %p1219_p0 = scmp.ne.s32.totalorder %s37_s28, %s1218_s9  ;;  %p1224_p2 = scmp.lt.s32.totalorder %s1218_s9, %s1218_s9 }
   0x8   :  { %p1225_p3 = por %p1224_p2, %p1223_p1 }
   0xa   :  { %p1226_p4 = pnand %p1225_p3, %p1219_p0 }
   0xc   :  { %1229 = shalt.err (!%p1226_p4)
}
   0xd   :  { %s1340_s10 = smov 64   ;;  %s1341_s11 = smov 4  }
   0xe   :  { %42 = dma.hbm_to_vmem [thread:$0]  %s1503_s2, 1024, %s37_s28, [#allocation6], %s1340_s10, %s1340_s10, %s1341_s11  }
   0xf   :  { %s1238_s14 = scalar_lea.vmem %s61_s30, 2048  ;;  %p1243_p6 = scmp.lt.s32.totalorder %s61_s30, %s61_s30 }
  0x10   :  { %p1239_p5 = scmp.ne.s32.totalorder %s61_s30, %s1238_s14  ;;  %p1244_p7 = scmp.lt.s32.totalorder %s1238_s14, %s1238_s14 }
  0x12   :  { %p1245_p8 = por %p1244_p7, %p1243_p6 }
  0x14   :  { %p1246_p9 = pnand %p1245_p8, %p1239_p5 }
  0x16   :  { %1249 = shalt.err (!%p1246_p9)
}
  0x17   :  { %s1342_s15 = smov 128   ;;  %s1343_s16 = smov 8  }
  0x18   :  { %66 = dma.hbm_to_vmem [thread:$0]  %s1505_s4, 2048, %s61_s30, [#allocation9], %s1342_s15, %s1342_s15, %s1343_s16  }
  0x19   :  { %s1344_s19 = smov [#allocation2]   ;;  %s1345_s21 = smov [#allocation7]  }
  0x1a   :  { %s24_s20 = sshll.u32 %s1344_s19, 4  ;;  %s48_s22 = sshll.u32 %s1345_s21, 4  ;;  %s25_s20 = int_to_ptr.vmem [resolvable:$true] %s24_s20  ;;  %s49_s22 = int_to_ptr.vmem [resolvable:$true] %s48_s22 }
  0x1b   :  { %s1258_s2 = scalar_lea.vmem %s25_s20, 1024  ;;  %p1263_p11 = scmp.lt.s32.totalorder %s25_s20, %s25_s20 }
  0x1c   :  { %p1259_p10 = scmp.ne.s32.totalorder %s25_s20, %s1258_s2  ;;  %p1264_p12 = scmp.lt.s32.totalorder %s1258_s2, %s1258_s2 }
  0x1e   :  { %p1265_p13 = por %p1264_p12, %p1263_p11 }
  0x20   :  { %p1266_p0 = pnand %p1265_p13, %p1259_p10 }
  0x22   :  { %1269 = shalt.err (!%p1266_p0)
}
  0x23   :  { %30 = dma.hbm_to_vmem [thread:$0]  %s1502_s1, 1024, %s25_s20, [#allocation3], %s1340_s10, %s1340_s10, %s1341_s11  }
  0x24   :  { %s1278_s4 = scalar_lea.vmem %s49_s22, 1024  ;;  %p1283_p2 = scmp.lt.s32.totalorder %s49_s22, %s49_s22 }
  0x25   :  { %p1279_p1 = scmp.ne.s32.totalorder %s49_s22, %s1278_s4  ;;  %p1284_p3 = scmp.lt.s32.totalorder %s1278_s4, %s1278_s4 }
  0x27   :  { %p1285_p4 = por %p1284_p3, %p1283_p2 }
  0x29   :  { %p1286_p5 = pnand %p1285_p4, %p1279_p1 }
  0x2b   :  { %1289 = shalt.err (!%p1286_p5)
}
  0x2c   :  { %54 = dma.hbm_to_vmem [thread:$0]  %s1504_s3, 1024, %s49_s22, [#allocation6], %s1340_s10, %s1340_s10, %s1341_s11  }
  0x2d   :  { %s1346_s27 = smov [#allocation10]  }
  0x2e   :  { %s72_s28 = sshll.u32 %s1346_s27, 4  ;;  %s73_s28 = int_to_ptr.vmem [resolvable:$true] %s72_s28 }
  0x2f   :  { %s1298_s29 = scalar_lea.vmem %s73_s28, 2048  ;;  %p1303_p7 = scmp.lt.s32.totalorder %s73_s28, %s73_s28 }
  0x30   :  { %p1299_p6 = scmp.ne.s32.totalorder %s73_s28, %s1298_s29  ;;  %p1304_p8 = scmp.lt.s32.totalorder %s1298_s29, %s1298_s29 }
  0x32   :  { %p1305_p9 = por %p1304_p8, %p1303_p7 }
  0x34   :  { %p1306_p10 = pnand %p1305_p9, %p1299_p6 }
  0x36   :  { %1309 = shalt.err (!%p1306_p10)
}
  0x37   :  { %78 = dma.hbm_to_vmem [thread:$0]  %s1506_s5, 2048, %s73_s28, [#allocation9], %s1340_s10, %s1340_s10, %s1341_s11  }
  0x38   :  { %1330 = dma.done.wait [#allocation3], 1024  }
  0x39   :  { %1331 = vsyncadd [#allocation3], 4294966272 }
  0x3a   :  { %1332 = dma.done.wait [#allocation6], 2048  }
  0x3b   :  { %1333 = vsyncadd [#allocation6], 4294965248 }
  0x3c   :  { %1334 = dma.done.wait [#allocation9], 4096  }
  0x3d   :  { %1335 = vsyncadd [#allocation9], 4294963200  ;;  %v1347_v0 = vmov 0.0   ;;  %vm1348_vm0 = vmmov 0   ;;  %v1132_v1 = vld [vmem:[#allocation2 + $0x38] sm:$0xff]   ;;  %v1133_v2 = vld [vmem:[#allocation2 + $0x30] sm:$0xff]  }
  0x3e   :  { %1058 = vmatprep.subr.bf16.mxu0 %v1347_v0  ;;  %1074 = vmatprep.mubr.msk.bf16.mxu0 %vm1348_vm0, %v1347_v0  ;;  %v1134_v3 = vld [vmem:[#allocation2 + $0x28] sm:$0xff]   ;;  %v1135_v4 = vld [vmem:[#allocation2 + $0x20] sm:$0xff]   ;;  %v1136_v5 = vld [vmem:[#allocation2 + $0x18] sm:$0xff]  }
  0x3f   :  { %1078 = vmatprep.subr.bf16.mxu1 %v1347_v0  ;;  %1094 = vmatprep.mubr.msk.bf16.mxu1 %vm1348_vm0, %v1347_v0  ;;  %v1137_v6 = vld [vmem:[#allocation2 + $0x10] sm:$0xff]   ;;  %v1138_v7 = vld [vmem:[#allocation2 + $0x8] sm:$0xff]   ;;  %v1139_v8 = vld [vmem:[#allocation2] sm:$0xff]  }
  0x40   :  { %1059 = vmatpush3.bf16.msra.mxu0 %v1132_v1  ;;  %v99_v9 = vld [vmem:[%s1501_s0] sm:$0xff]  ;;  %v1140_v11 = vld [vmem:[#allocation5 + $0x38] sm:$0xff]   ;;  %v1142_v13 = vld [vmem:[#allocation5 + $0x28] sm:$0xff]  }
  0x41   :  { %1060 = vmatprep.subr.bf16.mxu0 %v1347_v0  ;;  %v100_v10 = vpack.c.bf16 %v99_v9, %v99_v9  ;;  %1079 = vmatpush3.bf16.msra.mxu1 %v1140_v11  ;;  %v1141_v12 = vld [vmem:[#allocation5 + $0x30] sm:$0xff]   ;;  %v1143_v14 = vld [vmem:[#allocation5 + $0x20] sm:$0xff]   ;;  %v1144_v15 = vld [vmem:[#allocation5 + $0x18] sm:$0xff]  }
  0x42   :  { %1080 = vmatprep.subr.bf16.mxu1 %v1347_v0  ;;  %v1145_v16 = vld [vmem:[#allocation5 + $0x10] sm:$0xff]   ;;  %v1146_v17 = vld [vmem:[#allocation5 + $0x8] sm:$0xff]   ;;  %v1147_v18 = vld [vmem:[#allocation5] sm:$0xff]  }
  0x43   :  { %v225_v42 = vld [vmem:[%s1507_s6] ss:$0 sm:$0xff]  ;;  %v226_v45 = vld [vmem:[%s1507_s6 + $0x4] ss:$0 sm:$0xff]  ;;  %v1148_v52 = vld [vmem:[#allocation7 + $0x38] sm:$0xff]  }
  0x44   :  { %1061 = vmatpush3.bf16.msra.mxu0 %v1133_v2  ;;  %v1149_v53 = vld [vmem:[#allocation7 + $0x30] sm:$0xff]   ;;  %v1150_v54 = vld [vmem:[#allocation7 + $0x28] sm:$0xff]   ;;  %v1151_v55 = vld [vmem:[#allocation7 + $0x20] sm:$0xff]  }
  0x45   :  { %1062 = vmatprep.subr.bf16.mxu0 %v1347_v0  ;;  %1081 = vmatpush3.bf16.msra.mxu1 %v1141_v12  ;;  %v1152_v56 = vld [vmem:[#allocation7 + $0x18] sm:$0xff]   ;;  %v1153_v57 = vld [vmem:[#allocation7 + $0x10] sm:$0xff]   ;;  %v1154_v58 = vld [vmem:[#allocation7 + $0x8] sm:$0xff]  }
  0x46   :  { %1082 = vmatprep.subr.bf16.mxu1 %v1347_v0  ;;  %v1155_v59 = vld [vmem:[#allocation7] sm:$0xff]  }
  0x48   :  { %1063 = vmatpush3.bf16.msra.mxu0 %v1134_v3 }
  0x49   :  { %1064 = vmatprep.subr.bf16.mxu0 %v1347_v0  ;;  %1083 = vmatpush3.bf16.msra.mxu1 %v1142_v13 }
  0x4a   :  { %1084 = vmatprep.subr.bf16.mxu1 %v1347_v0 }
  0x4c   :  { %1065 = vmatpush3.bf16.msra.mxu0 %v1135_v4 }
  0x4d   :  { %1066 = vmatprep.subr.bf16.mxu0 %v1347_v0  ;;  %1085 = vmatpush3.bf16.msra.mxu1 %v1143_v14 }
  0x4e   :  { %1086 = vmatprep.subr.bf16.mxu1 %v1347_v0 }
  0x50   :  { %1067 = vmatpush3.bf16.msra.mxu0 %v1136_v5 }
  0x51   :  { %1068 = vmatprep.subr.bf16.mxu0 %v1347_v0  ;;  %1087 = vmatpush3.bf16.msra.mxu1 %v1144_v15 }
  0x52   :  { %1088 = vmatprep.subr.bf16.mxu1 %v1347_v0 }
  0x54   :  { %1069 = vmatpush3.bf16.msra.mxu0 %v1137_v6 }
  0x55   :  { %1070 = vmatprep.subr.bf16.mxu0 %v1347_v0  ;;  %1089 = vmatpush3.bf16.msra.mxu1 %v1145_v16 }
  0x56   :  { %1090 = vmatprep.subr.bf16.mxu1 %v1347_v0 }
  0x58   :  { %1071 = vmatpush3.bf16.msra.mxu0 %v1138_v7 }
  0x59   :  { %1072 = vmatprep.subr.bf16.mxu0 %v1347_v0  ;;  %1091 = vmatpush3.bf16.msra.mxu1 %v1146_v17 }
  0x5a   :  { %1092 = vmatprep.subr.bf16.mxu1 %v1347_v0 }
  0x5c   :  { %1073 = vmatpush3.bf16.msra.mxu0 %v1139_v8 }
  0x5d   :  { %1098 = vmatprep.subr.bf16.mxu0 %v1347_v0  ;;  %1093 = vmatpush3.bf16.msra.mxu1 %v1147_v18 }
  0x5f   :  { %1075 = vmatmul.mubr.bf16.vlgmr.msra.gmra.mxu0 %v100_v10 }
  0x60   :  { %1114 = vmatprep.mubr.msk.bf16.mxu0 %vm1348_vm0, %v1347_v0  ;;  %1099 = vmatpush3.bf16.msra.mxu0 %v1148_v52 }
  0x61   :  { %1100 = vmatprep.subr.bf16.mxu0 %v1347_v0 }
  0x64   :  { %1101 = vmatpush3.bf16.msra.mxu0 %v1149_v53 }
  0x65   :  { %1102 = vmatprep.subr.bf16.mxu0 %v1347_v0 }
  0x68   :  { %1103 = vmatpush3.bf16.msra.mxu0 %v1150_v54 }
  0x69   :  { %1104 = vmatprep.subr.bf16.mxu0 %v1347_v0 }
  0x6c   :  { %1105 = vmatpush3.bf16.msra.mxu0 %v1151_v55 }
  0x6d   :  { %1106 = vmatprep.subr.bf16.mxu0 %v1347_v0 }
  0x70   :  { %1107 = vmatpush3.bf16.msra.mxu0 %v1152_v56 }
  0x71   :  { %1108 = vmatprep.subr.bf16.mxu0 %v1347_v0 }
  0x74   :  { %1109 = vmatpush3.bf16.msra.mxu0 %v1153_v57 }
  0x75   :  { %1110 = vmatprep.subr.bf16.mxu0 %v1347_v0 }
  0x78   :  { %1111 = vmatpush3.bf16.msra.mxu0 %v1154_v58 }
  0x79   :  { %1112 = vmatprep.subr.bf16.mxu0 %v1347_v0 }
  0x7c   :  { %1113 = vmatpush3.bf16.msra.mxu0 %v1155_v59 }
 0x11f   :  { %v199_v19 = vpop.f32.mrf.mxu0 }
 0x120   :  { %v205_v20 = vrot.slane %v199_v19, 4  ;;  %v212_v21 = vmul.f32 %v199_v19, %v199_v19 }
 0x121   :  { %v1076_v22 = vpop.f32.mrf.mxu0 }
 0x122   :  { %v206_v23 = vadd.f32 %v205_v20, %v199_v19  ;;  %v213_v24 = vrot.slane %v212_v21, 4  ;;  %v359_v22 = vld [vmem:[%s1507_s6 + $0x5] ss:$0 sm:$0xff] }
 0x123   :  { %v202_v25 = vpop.f32.mrf.mxu0 }
 0x124   :  { %v207_v26 = vrot.slane %v206_v23, 2  ;;  %v214_v27 = vadd.f32 %v213_v24, %v212_v21 }
 0x125   :  { %v1077_v28 = vpop.f32.mrf.mxu0 }
 0x126   :  { %v208_v29 = vadd.f32 %v207_v26, %v206_v23  ;;  %v215_v30 = vrot.slane %v214_v27, 2 }
 0x128   :  { %v209_v31 = vrot.slane %v208_v29, 1  ;;  %v216_v32 = vadd.f32 %v215_v30, %v214_v27  ;;  %v1156_v30 = vld [vmem:[#allocation8 + $0x70] ss:$8 sps:$4 sm:$0xff]  }
 0x12a   :  { %v210_v33 = vadd.f32 %v209_v31, %v208_v29  ;;  %v217_v34 = vrot.slane %v216_v32, 1  ;;  %v1158_v29 = vld [vmem:[#allocation8 + $0x74] ss:$8 sps:$4 sm:$0xff]   ;;  %v1161_v31 = vld [vmem:[#allocation8 + $0x64] ss:$8 sps:$4 sm:$0xff]  }
 0x12b   :  { %596 = vmatprep.subr.bf16.mxu1 %v1158_v29  ;;  %v1194_v29 = vld [vmem:[#allocation10 + $0x40] sm:$0xff]  }
 0x12c   :  { %v211_v35 = vmul.f32 0.125, %v210_v33  ;;  %v218_v36 = vadd.f32 %v217_v34, %v216_v32  ;;  %v1159_v32 = vld [vmem:[#allocation8 + $0x60] ss:$8 sps:$4 sm:$0xff]   ;;  %v1164_v33 = vld [vmem:[#allocation8 + $0x54] ss:$8 sps:$4 sm:$0xff]  }
 0x12d   :  { %v1162_v34 = vld [vmem:[#allocation8 + $0x50] ss:$8 sps:$4 sm:$0xff]  }
 0x12e   :  { %v219_v37 = vmul.f32 0.125, %v218_v36  ;;  %v220_v38 = vmul.f32 %v211_v35, %v211_v35  ;;  %v1165_v36 = vld [vmem:[#allocation8 + $0x40] ss:$8 sps:$4 sm:$0xff]  }
 0x130   :  { %v221_v39 = vsub.f32 %v219_v37, %v220_v38  ;;  %v1170_v37 = vld [vmem:[#allocation8 + $0x34] ss:$8 sps:$4 sm:$0xff]   ;;  %v1168_v38 = vld [vmem:[#allocation8 + $0x30] ss:$8 sps:$4 sm:$0xff]  }
 0x132   :  { %v222_v40 = vmax.f32 %v221_v39, 0.0  ;;  %v1173_v39 = vld [vmem:[#allocation8 + $0x24] ss:$8 sps:$4 sm:$0xff]  }
 0x134   :  { %v223_v41 = vadd.f32 1e-05, %v222_v40  ;;  %v1171_v40 = vld [vmem:[#allocation8 + $0x20] ss:$8 sps:$4 sm:$0xff]  }
 0x136   :  { %1196 = vrsqrt.f32 %v223_v41  ;;  %v1176_v41 = vld [vmem:[#allocation8 + $0x14] ss:$8 sps:$4 sm:$0xff]  }
 0x143   :  { %v1197_v43 = vpop.eup %1196 }
 0x144   :  { %v227_v44 = vmul.f32 %v1197_v43, %v225_v42  ;;  %v1174_v42 = vld [vmem:[#allocation8 + $0x10] ss:$8 sps:$4 sm:$0xff]   ;;  %v1177_v43 = vld [vmem:[#allocation8] ss:$8 sps:$4 sm:$0xff]  }
 0x146   :  { %v228_v46 = vmul.f32 %v227_v44, %v211_v35  ;;  %v230_v47 = vmul.f32 %v227_v44, %v199_v19  ;;  %v358_v19 = vld [vmem:[%s1507_s6 + $0x1] ss:$0 sm:$0xff]  ;;  %v1167_v35 = vld [vmem:[#allocation8 + $0x44] ss:$8 sps:$4 sm:$0xff]  }
 0x147   :  { %v1179_v44 = vld [vmem:[#allocation8 + $0x4] ss:$8 sps:$4 sm:$0xff]  }
 0x148   :  { %v229_v48 = vsub.f32 %v226_v45, %v228_v46  ;;  %v1349_v45 = vmov 0  }
 0x14a   :  { %v231_v49 = vadd.f32 %v230_v47, %v229_v48 }
 0x14c   :  { %v232_v50 = vmax.f32 %v231_v49, 0.0 }
 0x14e   :  { %v233_v51 = vpack.c.bf16 %v232_v50, %v232_v50 }
 0x150   :  { %1095 = vmatmul.mubr.bf16.vlgmr.msra.gmra.mxu1 %v233_v51 }
 0x151   :  { %597 = vmatpush1.bf16.msra.mxu1 %v1156_v30  ;;  %628 = vmatprep.mubr.bf16.mxu1 %v1349_v45  ;;  %v1195_v30 = vld [vmem:[#allocation10] sm:$0xff]  }
 0x152   :  { %598 = vmatprep.subr.bf16.mxu1 %v1161_v31 }
 0x155   :  { %599 = vmatpush1.bf16.msra.mxu1 %v1159_v32 }
 0x156   :  { %600 = vmatprep.subr.bf16.mxu1 %v1164_v33 }
 0x159   :  { %601 = vmatpush1.bf16.msra.mxu1 %v1162_v34 }
 0x15a   :  { %602 = vmatprep.subr.bf16.mxu1 %v1167_v35 }
 0x15d   :  { %603 = vmatpush1.bf16.msra.mxu1 %v1165_v36 }
 0x15e   :  { %604 = vmatprep.subr.bf16.mxu1 %v1170_v37 }
 0x161   :  { %605 = vmatpush1.bf16.msra.mxu1 %v1168_v38 }
 0x162   :  { %606 = vmatprep.subr.bf16.mxu1 %v1173_v39 }
 0x165   :  { %607 = vmatpush1.bf16.msra.mxu1 %v1171_v40 }
 0x166   :  { %608 = vmatprep.subr.bf16.mxu1 %v1176_v41 }
 0x169   :  { %609 = vmatpush1.bf16.msra.mxu1 %v1174_v42 }
 0x16a   :  { %610 = vmatprep.subr.bf16.mxu1 %v1179_v44 }
 0x16d   :  { %611 = vmatpush1.bf16.msra.mxu1 %v1177_v43 }
 0x210   :  { %v332_v60 = vpop.f32.mrf.mxu1 }
 0x211   :  { %v338_v61 = vrot.slane %v332_v60, 4  ;;  %v345_v62 = vmul.f32 %v332_v60, %v332_v60 }
 0x212   :  { %v1096_v63 = vpop.f32.mrf.mxu1 }
 0x213   :  { %v339_v1 = vadd.f32 %v338_v61, %v332_v60  ;;  %v346_v2 = vrot.slane %v345_v62, 4 }
 0x214   :  { %v335_v3 = vpop.f32.mrf.mxu1 }
 0x215   :  { %v340_v4 = vrot.slane %v339_v1, 2  ;;  %v347_v5 = vadd.f32 %v346_v2, %v345_v62 }
 0x216   :  { %v1097_v6 = vpop.f32.mrf.mxu1 }
 0x217   :  { %v341_v7 = vadd.f32 %v340_v4, %v339_v1  ;;  %v348_v8 = vrot.slane %v347_v5, 2  ;;  %v491_v6 = vld [vmem:[%s1507_s6 + $0x2] ss:$0 sm:$0xff] }
 0x219   :  { %v342_v9 = vrot.slane %v341_v7, 1  ;;  %v349_v10 = vadd.f32 %v348_v8, %v347_v5 }
 0x21b   :  { %v343_v11 = vadd.f32 %v342_v9, %v341_v7  ;;  %v350_v12 = vrot.slane %v349_v10, 1  ;;  %v492_v9 = vld [vmem:[%s1507_s6 + $0x6] ss:$0 sm:$0xff] }
 0x21d   :  { %v344_v13 = vmul.f32 0.125, %v343_v11  ;;  %v351_v0 = vadd.f32 %v350_v12, %v349_v10 }
 0x21f   :  { %v352_v14 = vmul.f32 0.125, %v351_v0  ;;  %v353_v15 = vmul.f32 %v344_v13, %v344_v13 }
 0x221   :  { %v354_v16 = vsub.f32 %v352_v14, %v353_v15  ;;  %v1180_v15 = vld [vmem:[#allocation10 + $0x78] sm:$0xff]  }
 0x222   :  { %1036 = vmatprep.subr.bf16.mxu0 %v1180_v15 }
 0x223   :  { %v355_v17 = vmax.f32 %v354_v16, 0.0  ;;  %v1181_v16 = vld [vmem:[#allocation10 + $0x38] sm:$0xff]  }
 0x225   :  { %v356_v18 = vadd.f32 1e-05, %v355_v17  ;;  %v1182_v17 = vld [vmem:[#allocation10 + $0x70] sm:$0xff]  }
 0x227   :  { %1198 = vrsqrt.f32 %v356_v18  ;;  %v1183_v18 = vld [vmem:[#allocation10 + $0x30] sm:$0xff]  }
 0x234   :  { %v1199_v20 = vpop.eup %1198 }
 0x235   :  { %v360_v21 = vmul.f32 %v1199_v20, %v358_v19  ;;  %v1184_v19 = vld [vmem:[#allocation10 + $0x68] sm:$0xff]  }
 0x236   :  { %v1185_v20 = vld [vmem:[#allocation10 + $0x28] sm:$0xff]  }
 0x237   :  { %v361_v23 = vmul.f32 %v360_v21, %v344_v13  ;;  %v363_v25 = vmul.f32 %v360_v21, %v332_v60  ;;  %v1186_v21 = vld [vmem:[#allocation10 + $0x60] sm:$0xff]  }
 0x239   :  { %v362_v24 = vsub.f32 %v359_v22, %v361_v23  ;;  %v1187_v22 = vld [vmem:[#allocation10 + $0x20] sm:$0xff]   ;;  %v1188_v23 = vld [vmem:[#allocation10 + $0x58] sm:$0xff]  }
 0x23b   :  { %v364_v26 = vadd.f32 %v363_v25, %v362_v24  ;;  %v1189_v24 = vld [vmem:[#allocation10 + $0x18] sm:$0xff]   ;;  %v1190_v25 = vld [vmem:[#allocation10 + $0x50] sm:$0xff]  }
 0x23d   :  { %v365_v27 = vmax.f32 %v364_v26, 0.0  ;;  %v1191_v26 = vld [vmem:[#allocation10 + $0x10] sm:$0xff]  }
 0x23f   :  { %v366_v28 = vpack.c.bf16 %v365_v27, %v365_v27  ;;  %v1192_v27 = vld [vmem:[#allocation10 + $0x48] sm:$0xff]  }
 0x241   :  { %1115 = vmatmul.mubr.bf16.vlgmr.msra.gmra.mxu0 %v366_v28  ;;  %v1193_v28 = vld [vmem:[#allocation10 + $0x8] sm:$0xff]  }
 0x242   :  { %1037 = vmatpush3.bf16.msra.mxu0 %v1181_v16 }
 0x243   :  { %1038 = vmatprep.subr.bf16.mxu0 %v1182_v17 }
 0x246   :  { %1039 = vmatpush3.bf16.msra.mxu0 %v1183_v18 }
 0x247   :  { %1040 = vmatprep.subr.bf16.mxu0 %v1184_v19  ;;  %v990_v19 = vld [vmem:[%s1507_s6 + $0x3] ss:$8 sm:$0x3] }
 0x24a   :  { %1041 = vmatpush3.bf16.msra.mxu0 %v1185_v20 }
 0x24b   :  { %1042 = vmatprep.subr.bf16.mxu0 %v1186_v21 }
 0x24e   :  { %1043 = vmatpush3.bf16.msra.mxu0 %v1187_v22 }
 0x24f   :  { %1044 = vmatprep.subr.bf16.mxu0 %v1188_v23 }
 0x252   :  { %1045 = vmatpush3.bf16.msra.mxu0 %v1189_v24 }
 0x253   :  { %1046 = vmatprep.subr.bf16.mxu0 %v1190_v25 }
 0x256   :  { %1047 = vmatpush3.bf16.msra.mxu0 %v1191_v26 }
 0x257   :  { %1048 = vmatprep.subr.bf16.mxu0 %v1192_v27 }
 0x25a   :  { %1049 = vmatpush3.bf16.msra.mxu0 %v1193_v28 }
 0x25b   :  { %1050 = vmatprep.subr.bf16.mxu0 %v1194_v29 }
 0x25e   :  { %1051 = vmatpush3.bf16.msra.mxu0 %v1195_v30  ;;  %v991_v30 = vld [vmem:[%s1507_s6 + $0x7] ss:$8 sm:$0x3]  ;;  %s1351_s6 = smov [#allocation11]  }
 0x25f   :  { %s939_s4 = sshll.u32 %s1351_s6, 4  ;;  %s940_s4 = int_to_ptr.vmem [resolvable:$true] %s939_s4 }
 0x260   :  { %s1310_s25 = scalar_lea.vmem %s940_s4, 128  ;;  %p1315_p12 = scmp.lt.s32.totalorder %s940_s4, %s940_s4 }
 0x261   :  { %p1311_p11 = scmp.ne.s32.totalorder %s940_s4, %s1310_s25  ;;  %p1316_p13 = scmp.lt.s32.totalorder %s1310_s25, %s1310_s25 }
 0x263   :  { %p1317_p0 = por %p1316_p13, %p1315_p12 }
 0x265   :  { %p1318_p1 = pnand %p1317_p0, %p1311_p11 }
 0x301   :  { %v465_v46 = vpop.f32.mrf.mxu0 }
 0x302   :  { %v471_v47 = vrot.slane %v465_v46, 4  ;;  %v478_v48 = vmul.f32 %v465_v46, %v465_v46 }
 0x303   :  { %v1116_v49 = vpop.f32.mrf.mxu0 }
 0x304   :  { %v472_v50 = vadd.f32 %v471_v47, %v465_v46  ;;  %v479_v51 = vrot.slane %v478_v48, 4 }
 0x305   :  { %v468_v52 = vpop.f32.mrf.mxu0 }
 0x306   :  { %v473_v53 = vrot.slane %v472_v50, 2  ;;  %v480_v54 = vadd.f32 %v479_v51, %v478_v48 }
 0x307   :  { %v1117_v55 = vpop.f32.mrf.mxu0 }
 0x308   :  { %v474_v56 = vadd.f32 %v473_v53, %v472_v50  ;;  %v481_v57 = vrot.slane %v480_v54, 2 }
 0x30a   :  { %v475_v58 = vrot.slane %v474_v56, 1  ;;  %v482_v59 = vadd.f32 %v481_v57, %v480_v54 }
 0x30c   :  { %v476_v60 = vadd.f32 %v475_v58, %v474_v56  ;;  %v483_v61 = vrot.slane %v482_v59, 1 }
 0x30e   :  { %v477_v62 = vmul.f32 0.125, %v476_v60  ;;  %v484_v63 = vadd.f32 %v483_v61, %v482_v59 }
 0x310   :  { %v485_v1 = vmul.f32 0.125, %v484_v63  ;;  %v486_v2 = vmul.f32 %v477_v62, %v477_v62 }
 0x312   :  { %v487_v3 = vsub.f32 %v485_v1, %v486_v2 }
 0x314   :  { %v488_v4 = vmax.f32 %v487_v3, 0.0 }
 0x316   :  { %v489_v5 = vadd.f32 1e-05, %v488_v4 }
 0x318   :  { %1200 = vrsqrt.f32 %v489_v5 }
 0x325   :  { %v1201_v7 = vpop.eup %1200 }
 0x326   :  { %v493_v8 = vmul.f32 %v1201_v7, %v491_v6 }
 0x328   :  { %v494_v10 = vmul.f32 %v493_v8, %v477_v62  ;;  %v496_v12 = vmul.f32 %v493_v8, %v465_v46 }
 0x32a   :  { %v495_v11 = vsub.f32 %v492_v9, %v494_v10  ;;  %v1350_v10 = vmov 1966171168  }
 0x32c   :  { %v497_v13 = vadd.f32 %v496_v12, %v495_v11  ;;  %v685_v11 = vunpack.c.l.s4 %v1350_v10  ;;  %v687_v12 = vlaneseq }
 0x32e   :  { %v498_v0 = vmax.f32 %v497_v13, 0.0  ;;  %v686_v13 = vunpack.c.0.s8 %v685_v11 }
 0x330   :  { %v499_v14 = vpack.c.bf16 %v498_v0, %v498_v0  ;;  %v688_v0 = vshrl.u32 %v687_v12, 7 }
 0x332   :  { %629 = vmatmul.mubr.bf16.vlgmr.msra.gmra.mxu1 %v499_v14  ;;  %v689_v15 = vsub.s32 %v686_v13, %v688_v0  ;;  %v703_v21 = vsub.s32 0, %v688_v0  ;;  %v707_v22 = vsub.s32 1, %v688_v0 }
 0x3f2   :  { %v1475_v31 = vpop.f32.mrf.mxu1 }
 0x3f3   :  { %v637_v32 = vrot.slane %v1475_v31, 4  ;;  %v651_v33 = vmul.f32 %v1475_v31, %v1475_v31 }
 0x3f4   :  { %v1480_v34 = vpop.f32.mrf.mxu1 }
 0x3f5   :  { %v638_v35 = vadd.f32 %v637_v32, %v1475_v31  ;;  %v653_v36 = vrot.slane %v651_v33, 4  ;;  %v643_v37 = vrot.slane %v1480_v34, 4  ;;  %v652_v38 = vmul.f32 %v1480_v34, %v1480_v34 }
 0x3f6   :  { %v634_v39 = vpop.f32.mrf.mxu1 }
 0x3f7   :  { %v639_v40 = vrot.slane %v638_v35, 2  ;;  %v654_v41 = vadd.f32 %v653_v36, %v651_v33  ;;  %v644_v42 = vadd.f32 %v643_v37, %v1480_v34  ;;  %v659_v43 = vrot.slane %v652_v38, 4 }
 0x3f8   :  { %v635_v44 = vpop.f32.mrf.mxu1 }
 0x3f9   :  { %v640_v45 = vadd.f32 %v639_v40, %v638_v35  ;;  %v655_v46 = vrot.slane %v654_v41, 2  ;;  %v645_v47 = vrot.slane %v644_v42, 2  ;;  %v660_v48 = vadd.f32 %v659_v43, %v652_v38 }
 0x3fb   :  { %v641_v49 = vrot.slane %v640_v45, 1  ;;  %v656_v50 = vadd.f32 %v655_v46, %v654_v41  ;;  %v646_v51 = vadd.f32 %v645_v47, %v644_v42  ;;  %v661_v52 = vrot.slane %v660_v48, 2  ;;  %v992_v46 = vld [vmem:[%s1508_s7] ss:$0 sm:$0xff] }
 0x3fd   :  { %v642_v53 = vadd.f32 %v641_v49, %v640_v45  ;;  %v657_v54 = vrot.slane %v656_v50, 1  ;;  %v647_v55 = vrot.slane %v646_v51, 1  ;;  %v662_v56 = vadd.f32 %v661_v52, %v660_v48 }
 0x3ff   :  { %v649_v57 = vmul.f32 0.125, %v642_v53  ;;  %v658_v58 = vadd.f32 %v657_v54, %v656_v50  ;;  %v648_v59 = vadd.f32 %v647_v55, %v646_v51  ;;  %v663_v60 = vrot.slane %v662_v56, 1 }
 0x401   :  { %v665_v61 = vmul.f32 0.125, %v658_v58  ;;  %v667_v62 = vmul.f32 %v649_v57, %v649_v57  ;;  %v650_v63 = vmul.f32 0.125, %v648_v59  ;;  %v664_v1 = vadd.f32 %v663_v60, %v662_v56 }
 0x403   :  { %v669_v2 = vsub.f32 %v665_v61, %v667_v62  ;;  %v666_v3 = vmul.f32 0.125, %v664_v1  ;;  %v668_v4 = vmul.f32 %v650_v63, %v650_v63 }
 0x405   :  { %v671_v5 = vmax.f32 %v669_v2, 0.0  ;;  %v670_v6 = vsub.f32 %v666_v3, %v668_v4 }
 0x407   :  { %v673_v7 = vadd.f32 1e-05, %v671_v5  ;;  %v672_v8 = vmax.f32 %v670_v6, 0.0 }
 0x409   :  { %v674_v9 = vadd.f32 1e-05, %v672_v8  ;;  %1202 = vrsqrt.f32 %v673_v7 }
 0x40b   :  { %1204 = vrsqrt.f32 %v674_v9 }
 0x416   :  { %v1203_v14 = vpop.eup %1202 }
 0x418   :  { %v1205_v16 = vpop.eup %1204 }
 0x419   :  { %v683_v17 = vcombine.low %v1203_v14, %v1205_v16 }
 0x41b   :  { %v690_v18 = vrot.slane %v683_v17, %v689_v15 }
 0x41d   :  { %v697_v20 = vrot.slane %v690_v18, %v689_v15 }
 0x41f   :  { %v699_v23 = vmul.f32 %v990_v19, %v697_v20 }
 0x421   :  { %v704_v24 = vrot.slane %v699_v23, %v703_v21  ;;  %v708_v25 = vrot.slane %v699_v23, %v707_v22 }
 0x423   :  { %v711_v26 = vmul.f32 %v704_v24, %v649_v57  ;;  %v712_v27 = vmul.f32 %v708_v25, %v650_v63  ;;  %v733_v35 = vmul.f32 %v708_v25, %v1480_v34  ;;  %v732_v37 = vmul.f32 %v704_v24, %v1475_v31 }
 0x425   :  { %v715_v28 = vcombine.low %v711_v26, %v712_v27 }
 0x427   :  { %v722_v29 = vrot.slane %v715_v28, %v689_v15 }
 0x429   :  { %v729_v32 = vrot.slane %v722_v29, %v689_v15 }
 0x42b   :  { %v731_v33 = vsub.f32 %v991_v30, %v729_v32 }
 0x42d   :  { %v742_v36 = vrot.slane %v731_v33, %v707_v22  ;;  %v738_v38 = vrot.slane %v731_v33, %v703_v21 }
 0x42f   :  { %v746_v39 = vadd.f32 %v742_v36, %v733_v35  ;;  %v745_v40 = vadd.f32 %v738_v38, %v732_v37 }
 0x431   :  { %v748_v41 = vmax.f32 %v746_v39, 0.0  ;;  %v747_v42 = vmax.f32 %v745_v40, 0.0 }
 0x433   :  { %v750_v43 = vpack.c.bf16 %v748_v41, %v748_v41  ;;  %v749_v44 = vpack.c.bf16 %v747_v42, %v747_v42 }
 0x435   :  { %918 = vmatprep.mubr.bf16.mxu0 %v750_v43 }
 0x436   :  { %919 = vmatmul.mubr.bf16.vlgmr.msra.gmra.mxu0 %v749_v44 }
 0x4f6   :  { %v1052_v45 = vpop.f32.mrf.mxu0 }
 0x4f8   :  { %v1053_v47 = vpop.f32.mrf.mxu0 }
 0x4f9   :  { %v1054_v48 = vadd.f32 %v1053_v47, %v1052_v45 }
 0x4fa   :  { %v1055_v34 = vpop.f32.mrf.mxu0 }
 0x4fb   :  { %v921_v49 = vadd.f32 %v1054_v48, %v992_v46 }
 0x4fc   :  { %v1056_v50 = vpop.f32.mrf.mxu0 }
 0x4fd   :  { %v926_v31 = vsub.f32 0.0, %v921_v49 }
 0x4ff   :  { %v927_v51 = vmul.f32 1.442695, %v926_v31 }
 0x501   :  { %1206 = vpow2.f32 %v927_v51 }
 0x50e   :  { %v1207_v52 = vpop.eup %1206 }
 0x50f   :  { %v929_v53 = vadd.f32 1.0, %v1207_v52 }
 0x511   :  { %1208 = vrcp.f32 %v929_v53 }
 0x51e   :  { %v1209_v54 = vpop.eup %1208 }
 0x51f   :  { %v931_v55 = vmin.f32 %v1209_v54, 1.0 }
 0x521   :  { %932 = vst [vmem:[#allocation11] sm:$0xff] %v931_v55 }
 0x522   :  { %1321 = shalt.err (!%p1318_p1)
}
 0x523   :  { %942 = dma.vmem_to_hbm [thread:$0]  %s940_s4, 128, %s1509_s8, [#allocation4]  }
 0x524   :  { %1336 = dma.done.wait [#allocation4], 128  }
 0x525   :  { %1337 = vsyncadd [#allocation4], 4294967168 }
 0x526   :  { %946 = vsyncpa [#allocation3], 1 }
 0x527   :  { %947 = vsyncpa [#allocation6], 1 }
 0x528   :  { %948 = vsyncpa [#allocation9], 1 }
 0x529   :  { %949 = vsyncpa [#allocation4], 1 }

</bundles_post_ra>
